<compile_context>
chip_gen: v6e
topology: v6e:2x2x1
jax: 0.10.0
libtpu: 0.0.40
codegen_flags: <defaults>
</compile_context>

<pallas_src>
import functools

import numpy as np

import jax
import jax.numpy as jnp
from jax.experimental import pallas as pl
from jax.experimental.pallas import tpu as pltpu


# ----------------------------------------------------------------------------
# Parameter construction (mirrors LinearLayer.__init__). Built once per
# (obs_frames, pred_frames, diff) on the host in float64, returned as a plain
# NumPy float32 array (NOT a jnp array -> no tracer can be cached/leaked).
# ----------------------------------------------------------------------------
@functools.lru_cache(maxsize=None)
def _cached_pred_matrix_np(obs_frames: int, pred_frames: int, diff: float) -> np.ndarray:
    h, f = obs_frames, pred_frames
    if diff == 0:
        p_diag = np.ones((h,), dtype=np.float64)
    else:
        w = np.asarray([(i + 1) ** diff for i in range(h)], dtype=np.float64)
        e = np.exp(w - w.max())
        p_diag = e / e.sum()
    P = np.diag(p_diag)                                          # (h, h)
    x = np.arange(h, dtype=np.float64)
    x_p = np.arange(f, dtype=np.float64) + h
    A = np.stack([np.ones((h,)), x]).T                           # (h, 2)
    A_p = np.stack([np.ones((f,)), x_p]).T                       # (f, 2)
    W = np.linalg.inv(A.T @ P @ A) @ A.T @ P                     # (2, h)
    M = A_p @ W                                                  # (f, h)
    return M.astype(np.float32)


# ----------------------------------------------------------------------------
# Kernel: lane-dense matmul  out_block = M @ X_block
#   m_ref: (f, h)   resident prediction matrix (same tile every grid step)
#   x_ref: (h, TN)  lane block of packed trajectories (lane = 2*batch + coord)
#   o_ref: (f, TN)  lane block of predictions
# ----------------------------------------------------------------------------
def _linear_pred_kernel(m_ref, x_ref, o_ref):
    o_ref[...] = jnp.dot(
        m_ref[...], x_ref[...],
        preferred_element_type=jnp.float32,
        precision=jax.lax.Precision.HIGHEST,
    ).astype(o_ref.dtype)


# ----------------------------------------------------------------------------
# Forward wrapper (jitted; static shape params).
# ----------------------------------------------------------------------------
@functools.partial(jax.jit, static_argnums=(1, 2, 3, 4))
def linear_layer_forward(inputs: jnp.ndarray,
                         obs_frames: int,
                         pred_frames: int,
                         diff: float = 0.95,
                         lane_block: int = 16384) -> jnp.ndarray:
    """inputs: (B, obs_frames, 2) float32 -> (B, pred_frames, 2) float32."""
    B, h, c = inputs.shape
    assert h == obs_frames and c == 2
    f = pred_frames

    # Fresh constant per trace (host numpy -> device constant); no cached tracers.
    M = jnp.asarray(_cached_pred_matrix_np(h, f, float(diff)))   # (f, h) f32

    # Pack batch and coordinate onto the lane axis: (B, h, 2) -> (h, 2*B).
    total = 2 * B
    n128 = pl.cdiv(total, 128) * 128                             # 128-aligned lanes
    tn_cap = max(128, (lane_block // 128) * 128)
    if n128 <= tn_cap:
        # Single big block; pad only to the next 128 multiple (<128 junk lanes).
        # TODO(synk): on v7x force >=2 blocks here so both TensorCores engage.
        tn = n128
        n_pad = n128
    else:
        nblocks = pl.cdiv(n128, tn_cap)
        tn = pl.cdiv(pl.cdiv(n128, nblocks), 128) * 128
        n_pad = nblocks * tn                                     # waste <= 128*nblocks

    X = jnp.transpose(inputs, (1, 0, 2)).reshape(h, total)       # lane j = 2*b + c
    if n_pad != total:
        X = jnp.pad(X, ((0, 0), (0, n_pad - total)))

    # Scoped-VMEM budget: M + double-buffered X/out blocks + headroom.
    block_bytes = 4 * tn * (h + f)
    vmem_limit = int(min(64 * 1024 * 1024,
                         max(4 * block_bytes + (2 << 20), 16 * 1024 * 1024)))

    out = pl.pallas_call(
        _linear_pred_kernel,
        out_shape=jax.ShapeDtypeStruct((f, n_pad), jnp.float32),
        grid_spec=pltpu.PrefetchScalarGridSpec(
            num_scalar_prefetch=0,
            grid=(n_pad // tn,),
            in_specs=[
                pl.BlockSpec((f, h), lambda j: (0, 0)),          # M resident
                pl.BlockSpec((h, tn), lambda j: (0, j)),         # lane block of X
            ],
            out_specs=pl.BlockSpec((f, tn), lambda j: (0, j)),   # full f rows, no pad
        ),
        compiler_params=pltpu.CompilerParams(
            dimension_semantics=("parallel",),
            vmem_limit_bytes=vmem_limit),
    )(M, X)

    # (f, n_pad) -> (f, 2B) -> (f, B, 2) -> (B, f, 2)
    out = out[:, :total].reshape(f, B, 2)
    return jnp.transpose(out, (1, 0, 2))


# ----------------------------------------------------------------------------
# Pure-NumPy reference mirroring the PyTorch module (float64, cast to f32).
# ----------------------------------------------------------------------------
def _reference_forward_np(inputs_np: np.ndarray, obs_frames: int,
                          pred_frames: int, diff: float = 0.95) -> np.ndarray:
    h, f = obs_frames, pred_frames
    if diff == 0:
        p = np.ones((h,), dtype=np.float64)
    else:
        w = np.asarray([(i + 1) ** diff for i in range(h)], dtype=np.float64)
        e = np.exp(w - w.max())
        p = e / e.sum()
    P = np.diag(p)
    x = np.arange(h, dtype=np.float64)
    x_p = np.arange(f, dtype=np.float64) + h
    A = np.stack([np.ones((h,)), x]).T
    A_p = np.stack([np.ones((f,)), x_p]).T
    W = np.linalg.inv(A.T @ P @ A) @ A.T @ P
    M = A_p @ W                                                  # (f, h)
    out = np.einsum("fh,bhc->bfc", M, inputs_np.astype(np.float64))
    return out.astype(np.float32)                                # (B, f, 2)


if __name__ == "__main__":
    obs_frames, pred_frames, diff = 8, 12, 0.95

    # Small canonical shape (matches the module's expected input layout).
    batch = 2
    inputs = jax.random.normal(jax.random.PRNGKey(0),
                               (batch, obs_frames, 2), dtype=jnp.float32)
    out = jax.block_until_ready(
        linear_layer_forward(inputs, obs_frames, pred_frames, diff))
    ref = _reference_forward_np(np.asarray(inputs), obs_frames, pred_frames, diff)
    assert out.shape == (batch, pred_frames, 2)
    assert jnp.allclose(out, ref, atol=1e-4, rtol=1e-4)

    # Odd batch, forced small lane block: exercises lane packing, tail padding
    # and a multi-step "parallel" grid (total=394 lanes, TN=128 -> 4 steps).
    batch2 = 197
    inputs2 = jax.random.normal(jax.random.PRNGKey(1),
                                (batch2, obs_frames, 2), dtype=jnp.float32)
    out2 = jax.block_until_ready(
        linear_layer_forward(inputs2, obs_frames, pred_frames, diff, 128))
    ref2 = _reference_forward_np(np.asarray(inputs2), obs_frames, pred_frames, diff)
    assert out2.shape == (batch2, pred_frames, 2)
    assert jnp.allclose(out2, ref2, atol=1e-4, rtol=1e-4)

    # Larger batch with the default (big) lane block: single lane-dense tile,
    # padded only to the next 128 multiple (6000 -> 6016 lanes).
    batch3 = 3000
    inputs3 = jax.random.normal(jax.random.PRNGKey(2),
                                (batch3, obs_frames, 2), dtype=jnp.float32)
    out3 = jax.block_until_ready(
        linear_layer_forward(inputs3, obs_frames, pred_frames, diff))
    ref3 = _reference_forward_np(np.asarray(inputs3), obs_frames, pred_frames, diff)
    assert out3.shape == (batch3, pred_frames, 2)
    assert jnp.allclose(out3, ref3, atol=1e-4, rtol=1e-4)

    print("KERNEL_OK")
</pallas_src>

<mosaic_0001>
module attributes {stable_mosaic.version = 11 : i64} {
  func.func @_linear_pred_kernel(%arg0: i32, %arg1: memref<12x8xf32, #tpu.memory_space<vmem>>, %arg2: memref<8x128xf32, #tpu.memory_space<vmem>>, %arg3: memref<12x128xf32, #tpu.memory_space<vmem>>) attributes {dimension_semantics = [#tpu.dimension_semantics<parallel>], iteration_bounds = array<i64: 1>, scalar_prefetch = 0 : i64, scratch_operands = 0 : i64, tpu.core_type = #tpu.core_type<tc>, window_params = [{pipeline_mode = #tpu.pipeline_mode<synchronous>, transform_indices = @transform_0, window_bounds = array<i64: 12, 8>}, {transform_indices = @transform_1, window_bounds = array<i64: 8, 128>}, {transform_indices = @transform_2, window_bounds = array<i64: 12, 128>}]} {
    %c0 = arith.constant 0 : index
    %c0_0 = arith.constant 0 : index
    %0 = vector.load %arg1[%c0, %c0_0] : memref<12x8xf32, #tpu.memory_space<vmem>>, vector<12x8xf32>
    %c0_1 = arith.constant 0 : index
    %c0_2 = arith.constant 0 : index
    %1 = vector.load %arg2[%c0_1, %c0_2] : memref<8x128xf32, #tpu.memory_space<vmem>>, vector<8x128xf32>
    %cst = arith.constant dense<0.000000e+00> : vector<12x128xf32>
    %2 = tpu.matmul %0, %1, %cst {dimension_numbers = #tpu.dot_dimension_numbers<[1], [0], [0], [1], [0, 0, 1, 1], [], []>, precision = #tpu.contract_precision<fp32>} : vector<12x8xf32>, vector<8x128xf32>, vector<12x128xf32> -> vector<12x128xf32>
    %c0_3 = arith.constant 0 : index
    %c0_4 = arith.constant 0 : index
    %3 = vector.load %arg3[%c0_3, %c0_4] : memref<12x128xf32, #tpu.memory_space<vmem>>, vector<12x128xf32>
    tpu.vector_store %arg3[%c0_3, %c0_4], %2 {strides = array<i32>} : memref<12x128xf32, #tpu.memory_space<vmem>>, vector<12x128xf32>,
    return
  }
  func.func @transform_0(%arg0: i32) -> (i32, i32) {
    %c0_i32 = arith.constant 0 : i32
    %c0_i32_0 = arith.constant 0 : i32
    %c0_i32_1 = arith.constant 0 : i32
    return %c0_i32, %c0_i32_0 : i32, i32
  }
  func.func @transform_1(%arg0: i32) -> (i32, i32) {
    %c0_i32 = arith.constant 0 : i32
    %c0_i32_0 = arith.constant 0 : i32
    return %c0_i32, %arg0 : i32, i32
  }
  func.func @transform_2(%arg0: i32) -> (i32, i32) {
    %c0_i32 = arith.constant 0 : i32
    %c0_i32_0 = arith.constant 0 : i32
    return %c0_i32, %arg0 : i32, i32
  }
}

</mosaic_0001>

<bundles_post_ra>
// kernel: linear_layer_forward.1
= control target key start
LH: loop header
LB: loop body
LE: loop exit
PB: predicated region body
PF: predicated region fallthrough
CT: control target
= control target key end

     0   :  { %vm14_vm0 = vcmask 64512   ;;  %s594_s1 = inlined_call_operand.vmem [shape: f32[8,128], index: 1, kind: input, shape index: {}]   ;;  %s595_s0 = inlined_call_operand.vmem [shape: f32[12,8], index: 0, kind: input, shape index: {}]   ;;  %s596_s2 = inlined_call_operand.vmem [shape: f32[12,128], index: 2, kind: output, shape index: {}]  }
   0x1   :  { %v13_v0 = vld [vmem:[%s594_s1] sm:$0xff]  ;;  %v12_v2 = vld [vmem:[%s595_s0 + $0x8] sm:$0xf] }
   0x2   :  { %v11_v1 = vld [vmem:[%s595_s0] sm:$0xff]  ;;  %v52_v3 = vand.u32 4294901760, %v13_v0  ;;  %v19_v5 = vsel %vm14_vm0, %v12_v2, 0 }
   0x3   :  { %v16_v4 = vsel %vm14_vm0, %v11_v1, 0  ;;  %v97_v7 = vand.u32 4294901760, %v19_v5 }
   0x4   :  { %v87_v6 = vand.u32 4294901760, %v16_v4  ;;  %534 = vmatprep.subr.mxu0 %v52_v3  ;;  %v139_v8 = vsub.f32 %v13_v0, %v52_v3 }
   0x5   :  { %535 = vmatpush3.msra.mxu0 %v52_v3  ;;  %v98_v10 = vsub.f32 %v19_v5, %v97_v7 }
   0x6   :  { %v88_v9 = vsub.f32 %v16_v4, %v87_v6  ;;  %541 = vmatprep.mubr.f32.mxu1 %v87_v6  ;;  %v140_v11 = vand.u32 4294901760, %v139_v8  ;;  %544 = vmatprep.subr.mxu0 %v139_v8 }
   0x7   :  { %v99_v13 = vand.u32 4294901760, %v98_v10 }
   0x8   :  { %v89_v12 = vand.u32 4294901760, %v88_v9  ;;  %v141_v14 = vsub.f32 %v139_v8, %v140_v11 }
   0x9   :  { %v100_v16 = vsub.f32 %v98_v10, %v99_v13 }
   0xa   :  { %v90_v15 = vsub.f32 %v88_v9, %v89_v12  ;;  %v142_v17 = vand.u32 4294901760, %v141_v14 }
   0xb   :  { %v101_v19 = vand.u32 4294901760, %v100_v16 }
   0xc   :  { %v91_v18 = vand.u32 4294901760, %v90_v15  ;;  %539 = vmatprep.subr.mxu1 %v142_v17 }
   0xd   :  { %540 = vmatpush3.msra.mxu1 %v142_v17 }
   0xe   :  { %536 = vmatprep.mubr.f32.mxu0 %v91_v18  ;;  %542 = vmatmul.mubr.f32.vlgmr.msra.gmra.mxu1 %v97_v7 }
   0xf   :  { %537 = vmatmul.mubr.f32.vlgmr.msra.gmra.mxu0 %v101_v19  ;;  %549 = vmatprep.subr.mxu1 %v52_v3 }
  0x10   :  { %545 = vmatpush3.msra.mxu0 %v139_v8  ;;  %550 = vmatpush3.msra.mxu1 %v52_v3 }
  0x11   :  { %546 = vmatprep.mubr.f32.mxu0 %v88_v9  ;;  %551 = vmatprep.mubr.f32.mxu1 %v89_v12 }
  0x12   :  { %554 = vmatprep.subr.mxu0 %v140_v11  ;;  %552 = vmatmul.mubr.f32.vlgmr.msra.gmra.mxu1 %v99_v13 }
  0x13   :  { %547 = vmatmul.mubr.f32.vlgmr.msra.gmra.mxu0 %v98_v10  ;;  %559 = vmatprep.subr.mxu1 %v52_v3 }
  0x14   :  { %555 = vmatpush3.msra.mxu0 %v140_v11  ;;  %560 = vmatpush3.msra.mxu1 %v52_v3 }
  0x15   :  { %556 = vmatprep.mubr.f32.mxu0 %v87_v6  ;;  %561 = vmatprep.mubr.f32.mxu1 %v87_v6 }
  0x16   :  { %562 = vmatmul.mubr.f32.vlgmr.msra.gmra.mxu1 %v97_v7 }
  0x17   :  { %557 = vmatmul.mubr.f32.vlgmr.msra.gmra.mxu0 %v97_v7 }
  0xce   :  { %v543_v21 = vpop.f32.mrf.mxu1 }
  0xcf   :  { %v538_v20 = vpop.f32.mrf.mxu0 }
  0xd0   :  { %v179_v23 = vpop.f32.mrf.mxu1  ;;  %v186_v24 = vadd.f32 %v543_v21, %v538_v20 }
  0xd1   :  { %v93_v22 = vpop.f32.mrf.mxu0 }
  0xd2   :  { %v553_v26 = vpop.f32.mrf.mxu1  ;;  %v180_v27 = vadd.f32 %v179_v23, %v93_v22 }
  0xd3   :  { %v548_v25 = vpop.f32.mrf.mxu0 }
  0xd4   :  { %v267_v28 = vadd.f32 %v548_v25, %v186_v24  ;;  %v340_v30 = vpop.f32.mrf.mxu1 }
  0xd5   :  { %v259_v29 = vpop.f32.mrf.mxu0 }
  0xd6   :  { %v349_v31 = vadd.f32 %v553_v26, %v267_v28  ;;  %v260_v32 = vadd.f32 %v259_v29, %v180_v27  ;;  %v563_v34 = vpop.f32.mrf.mxu1 }
  0xd7   :  { %v558_v33 = vpop.f32.mrf.mxu0 }
  0xd8   :  { %v341_v35 = vadd.f32 %v340_v30, %v260_v32  ;;  %v429_v36 = vadd.f32 %v558_v33, %v349_v31  ;;  %v500_v40 = vpop.f32.mrf.mxu1 }
  0xd9   :  { %v422_v37 = vpop.f32.mrf.mxu0 }
  0xda   :  { %v507_v38 = vadd.f32 %v563_v34, %v429_v36  ;;  %v423_v39 = vadd.f32 %v422_v37, %v341_v35 }
  0xdc   :  { %511 = vst [vmem:[%s596_s2 + $0x8] sm:$0xf] %v507_v38  ;;  %v501_v41 = vadd.f32 %v500_v40, %v423_v39 }
  0xde   :  { %510 = vst [vmem:[%s596_s2] sm:$0xff] %v501_v41 }

</bundles_post_ra>
